<compile_context>
chip_gen: v7x
topology: tpu7x:2x2x1
jax: 0.10.0
libtpu: 0.0.40
codegen_flags: <defaults>
</compile_context>

<pallas_src>
import jax
import jax.numpy as jnp
from jax.experimental import pallas as pl
from jax.experimental.pallas import tpu as pltpu


def bert_pooler_kernel(x_ref, w_ref, b_ref, o_ref):
    # x_ref: (tb, H_in)        -- first-token rows of this batch tile (pipelined)
    # w_ref: (H_in, H_out_p)   -- VMEM-resident across all grid steps (single-buffered)
    # b_ref: (1, H_out_p) f32  -- resident, pre-cast to f32 at parameter-prep time
    # o_ref: (tb, H_out_p)     -- lane-dense (H_out padded to a multiple of 128)
    x = x_ref[...].astype(w_ref.dtype)   # bf16 MXU path; no-op when compute_dtype == x.dtype
    acc = jnp.dot(x, w_ref[...], preferred_element_type=jnp.float32)
    acc = acc + b_ref[...]               # f32 broadcast add (VPU, co-issues under the matmul)
    o_ref[...] = jnp.tanh(acc).astype(o_ref.dtype)   # EUP tanh in f32, downcast on store


def prepare_pooler_params(weight, bias, *, compute_dtype=jnp.bfloat16):
    """One-time parameter prep. Do this at parameter-load time, NOT per forward call.

    weight: (H_out, H_in) nn.Linear weight (PyTorch layout); bias: (H_out,)
    Returns (w_t, b2): (H_in, H_out_p) compute_dtype and (1, H_out_p) f32, with H_out
    padded to a multiple of 128 so the kernel's output stores are full-lane vst.
    """
    H_out, H_in = weight.shape
    H_out_p = pl.cdiv(H_out, 128) * 128
    w_t = jnp.zeros((H_in, H_out_p), compute_dtype)
    w_t = w_t.at[:, :H_out].set(weight.T.astype(compute_dtype))
    b2 = jnp.zeros((1, H_out_p), jnp.float32)
    b2 = b2.at[:, :H_out].set(bias.astype(jnp.float32))
    return w_t, b2


def _pick_batch_tile(B):
    # <=256 rows: single step. Larger: prefer an even number of >=256-row tiles so the
    # single "parallel" grid axis shards evenly across v7x's 2 TensorCores (neutral on
    # v5e/v6e which have 1 TC). 256/512 keep the MXU M dim at 1-2x its 256-wide tile.
    if B <= 256:
        return B
    if pl.cdiv(B, 512) % 2 == 0:
        return 512
    if pl.cdiv(B, 256) % 2 == 0:
        return 256
    return 512


def bert_pooler_prepared(x, w_t, b2, h_out, *, tb=None, out_dtype=None):
    """Hot-path forward: tanh(x[:, 0, :] @ W.T + b) with pre-prepared parameters.

    x: (B, S, H_in); (w_t, b2) from prepare_pooler_params(); h_out = original H_out.
    """
    B, S, H_in = x.shape
    H_out_p = w_t.shape[1]
    out_dtype = x.dtype if out_dtype is None else out_dtype

    # First-token slice as a plain XLA strided slice: only row 0 of each sequence is
    # read from HBM (B*H_in elements), never the full (B, S, H_in) tensor.
    x0 = x[:, 0, :]

    if tb is None:
        tb = _pick_batch_tile(B)
    tb = min(tb, B)
    grid = (pl.cdiv(B, tb),)

    x_itemsize = jnp.dtype(x.dtype).itemsize
    o_itemsize = jnp.dtype(out_dtype).itemsize
    w_bytes = w_t.size * jnp.dtype(w_t.dtype).itemsize
    b_bytes = b2.size * 4

    # VMEM budget: single-buffered params + double-buffered x / out tiles, 2x headroom,
    # floored at 16 MiB and capped at 64 MiB (v7x physical VMEM per TC).
    vmem_need = (w_bytes + b_bytes
                 + 2 * tb * H_in * x_itemsize
                 + 2 * tb * H_out_p * o_itemsize)
    vmem_limit = int(min(max(2 * vmem_need, 16 * 1024 * 1024), 64 * 1024 * 1024))

    cost = pl.CostEstimate(
        flops=2 * B * H_in * H_out_p,
        transcendentals=B * H_out_p,
        bytes_accessed=(B * H_in * x_itemsize + w_bytes + b_bytes
                        + B * H_out_p * o_itemsize),
    )

    out = pl.pallas_call(
        bert_pooler_kernel,
        out_shape=jax.ShapeDtypeStruct((B, H_out_p), out_dtype),
        grid_spec=pltpu.PrefetchScalarGridSpec(
            num_scalar_prefetch=0,
            grid=grid,
            in_specs=[
                # Pipelined first-token batch tile (default double-buffering).
                pl.BlockSpec((tb, H_in), lambda i: (i, 0)),
                # Resident params: constant index_map + single buffer (no refetch).
                pl.BlockSpec((H_in, H_out_p), lambda i: (0, 0),
                             pipeline_mode=pl.Buffered(1)),
                pl.BlockSpec((1, H_out_p), lambda i: (0, 0),
                             pipeline_mode=pl.Buffered(1)),
            ],
            out_specs=pl.BlockSpec((tb, H_out_p), lambda i: (i, 0)),
        ),
        compiler_params=pltpu.CompilerParams(
            # Batch axis is embarrassingly parallel: lets v7x shard tiles across its 2 TCs.
            dimension_semantics=("parallel",),
            vmem_limit_bytes=vmem_limit,
        ),
        cost_estimate=cost,
    )(x0, w_t, b2)

    # Strip lane padding (tiny (B, H_out) slice, not on the hot path).
    return out[:, :h_out] if H_out_p != h_out else out


def bert_pooler(x, weight, bias, *, compute_dtype=jnp.bfloat16, tb=None, out_dtype=None):
    """Convenience wrapper matching the PyTorch module signature.

    NOTE: re-prepares (transposes/pads/casts) the weight on every call. For production,
    call prepare_pooler_params() once at load time and use bert_pooler_prepared().
    """
    w_t, b2 = prepare_pooler_params(weight, bias, compute_dtype=compute_dtype)
    return bert_pooler_prepared(x, w_t, b2, weight.shape[0], tb=tb, out_dtype=out_dtype)


if __name__ == "__main__":
    # Small shapes consistent with the module: batch=2, seq=8, hidden_in=32, hidden_out=32
    B, S, H_in, H_out = 2, 8, 32, 32
    key = jax.random.PRNGKey(0)
    kx, kw, kb = jax.random.split(key, 3)

    x = jax.random.normal(kx, (B, S, H_in), dtype=jnp.float32)
    # nn.Linear(input_features, output_features): weight (H_out, H_in), bias (H_out,)
    weight = jax.random.normal(kw, (H_out, H_in), dtype=jnp.float32) * 0.02
    bias = jax.random.normal(kb, (H_out,), dtype=jnp.float32) * 0.02

    # Reference (same math as the PyTorch forward, in f32).
    ref = jnp.tanh(x[:, 0, :] @ weight.T + bias)

    # Production path: one-time param prep (bf16 MXU), then the hot-path call.
    w_t, b2 = prepare_pooler_params(weight, bias, compute_dtype=jnp.bfloat16)
    out_bf16 = bert_pooler_prepared(x, w_t, b2, H_out)
    jax.block_until_ready(out_bf16)
    assert out_bf16.shape == (B, H_out)
    assert jnp.allclose(out_bf16, ref, atol=2e-2, rtol=2e-2)

    # Exactness check via the f32 path (same kernel, compute_dtype=f32), through the
    # convenience wrapper.
    out_f32 = bert_pooler(x, weight, bias, compute_dtype=jnp.float32)
    jax.block_until_ready(out_f32)
    assert out_f32.shape == (B, H_out)
    assert jnp.allclose(out_f32, ref, atol=1e-5, rtol=1e-5)

    print("KERNEL_OK")
</pallas_src>

<mosaic_0001>
module attributes {stable_mosaic.version = 11 : i64} {
  func.func @bert_pooler_kernel(%arg0: i32, %arg1: memref<2x32xf32, #tpu.memory_space<vmem>>, %arg2: memref<32x128xbf16, #tpu.memory_space<vmem>>, %arg3: memref<1x128xf32, #tpu.memory_space<vmem>>, %arg4: memref<2x128xf32, #tpu.memory_space<vmem>>) attributes {dimension_semantics = [#tpu.dimension_semantics<parallel>], iteration_bounds = array<i64: 1>, scalar_prefetch = 0 : i64, scratch_operands = 0 : i64, tpu.core_type = #tpu.core_type<tc>, window_params = [{transform_indices = @transform_0, window_bounds = array<i64: 2, 32>}, {pipeline_mode = #tpu.pipeline_mode<synchronous>, transform_indices = @transform_1, window_bounds = array<i64: 32, 128>}, {pipeline_mode = #tpu.pipeline_mode<synchronous>, transform_indices = @transform_2, window_bounds = array<i64: 1, 128>}, {transform_indices = @transform_3, window_bounds = array<i64: 2, 128>}]} {
    %c0 = arith.constant 0 : index
    %c0_0 = arith.constant 0 : index
    %0 = vector.load %arg1[%c0, %c0_0] : memref<2x32xf32, #tpu.memory_space<vmem>>, vector<2x32xf32>
    %1 = arith.truncf %0 : vector<2x32xf32> to vector<2x32xbf16>
    %c0_1 = arith.constant 0 : index
    %c0_2 = arith.constant 0 : index
    %2 = vector.load %arg2[%c0_1, %c0_2] : memref<32x128xbf16, #tpu.memory_space<vmem>>, vector<32x128xbf16>
    %cst = arith.constant dense<0.000000e+00> : vector<2x128xf32>
    %3 = tpu.matmul %1, %2, %cst {dimension_numbers = #tpu.dot_dimension_numbers<[1], [0], [0], [1], [0, 0, 1, 1], [], []>} : vector<2x32xbf16>, vector<32x128xbf16>, vector<2x128xf32> -> vector<2x128xf32>
    %c0_3 = arith.constant 0 : index
    %c0_4 = arith.constant 0 : index
    %4 = vector.load %arg3[%c0_3, %c0_4] : memref<1x128xf32, #tpu.memory_space<vmem>>, vector<1x128xf32>
    %5 = vector.broadcast %4 : vector<1x128xf32> to vector<2x128xf32>
    %6 = arith.addf %3, %5 : vector<2x128xf32>
    %7 = math.tanh %6 : vector<2x128xf32>
    %c0_5 = arith.constant 0 : index
    %c0_6 = arith.constant 0 : index
    %8 = vector.load %arg4[%c0_5, %c0_6] : memref<2x128xf32, #tpu.memory_space<vmem>>, vector<2x128xf32>
    tpu.vector_store %arg4[%c0_5, %c0_6], %7 {strides = array<i32>} : memref<2x128xf32, #tpu.memory_space<vmem>>, vector<2x128xf32>,
    return
  }
  func.func @transform_0(%arg0: i32) -> (i32, i32) {
    %c0_i32 = arith.constant 0 : i32
    %c0_i32_0 = arith.constant 0 : i32
    return %arg0, %c0_i32 : i32, i32
  }
  func.func @transform_1(%arg0: i32) -> (i32, i32) {
    %c0_i32 = arith.constant 0 : i32
    %c0_i32_0 = arith.constant 0 : i32
    %c0_i32_1 = arith.constant 0 : i32
    return %c0_i32, %c0_i32_0 : i32, i32
  }
  func.func @transform_2(%arg0: i32) -> (i32, i32) {
    %c0_i32 = arith.constant 0 : i32
    %c0_i32_0 = arith.constant 0 : i32
    %c0_i32_1 = arith.constant 0 : i32
    return %c0_i32, %c0_i32_0 : i32, i32
  }
  func.func @transform_3(%arg0: i32) -> (i32, i32) {
    %c0_i32 = arith.constant 0 : i32
    %c0_i32_0 = arith.constant 0 : i32
    return %arg0, %c0_i32 : i32, i32
  }
}

</mosaic_0001>

<bundles_post_ra>
// kernel: tpu_custom_call.1
= control target key start
LH: loop header
LB: loop body
LE: loop exit
PB: predicated region body
PF: predicated region fallthrough
CT: control target
= control target key end

     0   :  { %8 = vsyncpa [#allocation3], 0  ;;  %s300_s0 = inlined_call_operand.hbm [shape: f32[2,32], index: 0, kind: input, shape index: {}]   ;;  %s301_s1 = inlined_call_operand.hbm [shape: bf16[32,128], index: 1, kind: input, shape index: {}]   ;;  %s302_s2 = inlined_call_operand.vmem [shape: f32[1,128], index: 2, kind: input, shape index: {}]   ;;  %s303_s3 = inlined_call_operand.hbm [shape: f32[2,128], index: 3, kind: output, shape index: {}]  }
   0x1   :  { %9 = vsyncpa [#allocation6], 0 }
   0x2   :  { %10 = vsyncpa [#allocation4], 0  ;;  %s227_s12 = smov [#allocation2]   ;;  %s228_s14 = smov [#allocation5]  }
   0x3   :  { %s17_s13 = sshll.u32 %s227_s12, 4  ;;  %s26_s15 = sshll.u32 %s228_s14, 4  ;;  %s18_s13 = int_to_ptr.vmem [resolvable:$true] %s17_s13  ;;  %s254_s15 = int_to_ptr.vmem [resolvable:$true] %s26_s15 }
   0x4   :  { %s155_s18 = scalar_lea.hbm %s300_s0, 32 }
   0x5   :  { %p156_p0 = scmp.ne.s32.totalorder %s300_s0, %s155_s18  ;;  %p159_p1 = scmp.lt.u32.totalorder %s155_s18, %s300_s0 }
   0x7   :  { %p161_p2 = pnand %p159_p1, %p156_p0 }
   0x9   :  { %164 = shalt.err (!%p161_p2)
}
   0xa   :  { %s165_s23 = scalar_lea.vmem %s18_s13, 32  ;;  %p170_p4 = scmp.lt.s32.totalorder %s18_s13, %s18_s13 }
   0xb   :  { %p166_p3 = scmp.ne.s32.totalorder %s18_s13, %s165_s23  ;;  %p171_p5 = scmp.lt.s32.totalorder %s165_s23, %s165_s23 }
   0xd   :  { %p172_p6 = por %p171_p5, %p170_p4 }
   0xf   :  { %p173_p7 = pnand %p172_p6, %p166_p3 }
  0x11   :  { %176 = shalt.err (!%p173_p7)
}
  0x12   :  { %20 = dma.hbm_to_vmem [thread:$0]  %s300_s0, 32, %s18_s13, [#allocation3]  }
  0x13   :  { %s177_s28 = scalar_lea.hbm %s301_s1, 256 }
  0x14   :  { %p178_p8 = scmp.ne.s32.totalorder %s301_s1, %s177_s28  ;;  %p181_p9 = scmp.lt.u32.totalorder %s177_s28, %s301_s1 }
  0x16   :  { %p183_p10 = pnand %p181_p9, %p178_p8 }
  0x18   :  { %186 = shalt.err (!%p183_p10)
}
  0x19   :  { %s187_s6 = scalar_lea.vmem %s254_s15, 256  ;;  %p192_p12 = scmp.lt.s32.totalorder %s254_s15, %s254_s15 }
  0x1a   :  { %p188_p11 = scmp.ne.s32.totalorder %s254_s15, %s187_s6  ;;  %p193_p13 = scmp.lt.s32.totalorder %s187_s6, %s187_s6 }
  0x1c   :  { %p194_p0 = por %p193_p13, %p192_p12 }
  0x1e   :  { %p195_p1 = pnand %p194_p0, %p188_p11 }
  0x20   :  { %198 = shalt.err (!%p195_p1)
}
  0x21   :  { %s229_s0 = smov 64   ;;  %s230_s7 = smov 4  }
  0x22   :  { %32 = dma.hbm_to_vmem [thread:$0]  %s301_s1, 256, %s254_s15, [#allocation6], %s229_s0, %s229_s0, %s230_s7  }
  0x23   :  { %221 = dma.done.wait [#allocation3], 32  }
  0x24   :  { %222 = vsyncadd [#allocation3], 4294967264 }
  0x25   :  { %223 = dma.done.wait [#allocation6], 256  }
  0x26   :  { %224 = vsyncadd [#allocation6], 4294967040  ;;  %v231_v0 = vmov 0.0   ;;  %vm232_vm0 = vmmov 0   ;;  %v151_v1 = vld [vmem:[#allocation5] sm:$0xff]   ;;  %v152_v2 = vld [vmem:[#allocation5 + $0x8] sm:$0xff]  }
  0x27   :  { %136 = vmatprep.subr.bf16.mxu0 %v231_v0  ;;  %140 = vmatprep.mubr.msk.bf16.mxu0 %vm232_vm0, %v231_v0  ;;  %v42_v3 = vld [vmem:[#allocation2] sm:$0x3]  ;;  %vm67_vm1 = vcmask 261120   ;;  %s233_s1 = smov [#allocation7]  }
  0x28   :  { %137 = vmatpush3.bf16.msra.mxu0 %v151_v1  ;;  %v43_v4 = vpack.c.bf16 %v42_v3, %v42_v3  ;;  %v129_v5 = vld [vmem:[%s302_s2] ss:$0 sm:$0xff]  ;;  %s119_s12 = sshll.u32 %s233_s1, 4  ;;  %s120_s12 = int_to_ptr.vmem [resolvable:$true] %s119_s12 }
  0x29   :  { %138 = vmatprep.subr.bf16.mxu0 %v231_v0  ;;  %s199_s13 = scalar_lea.vmem %s120_s12, 32  ;;  %p204_p3 = scmp.lt.s32.totalorder %s120_s12, %s120_s12 }
  0x2a   :  { %p200_p2 = scmp.ne.s32.totalorder %s120_s12, %s199_s13  ;;  %p205_p4 = scmp.lt.s32.totalorder %s199_s13, %s199_s13 }
  0x2c   :  { %139 = vmatpush3.bf16.msra.mxu0 %v152_v2  ;;  %p206_p5 = por %p205_p4, %p204_p3 }
  0x2e   :  { %p207_p6 = pnand %p206_p5, %p200_p2 }
  0x2f   :  { %141 = vmatmul.mubr.msk.bf16.vlgmr.msra.gmra.mrb[0].mxu0 %vm67_vm1, %v43_v4 }
 0x102   :  { %v105_v6 = vpop.f32.mrb[0].mxu0 }
 0x103   :  { %v106_v7 = vadd.f32 %v129_v5, %v105_v6  ;;  %v142_v8 = vpop.f32.mrb[1].mxu0 }
 0x104   :  { %v108_v9 = vpop.f32.mrb[2].mxu0 }
 0x105   :  { %153 = vtanh.f32 %v106_v7  ;;  %v143_v10 = vpop.f32.mrb[3].mxu0 }
 0x10f   :  { %v154_v11 = vpop.eup %153 }
 0x110   :  { %112 = vst [vmem:[#allocation7] sm:$0x3] %v154_v11 }
 0x111   :  { %210 = shalt.err (!%p207_p6)
}
 0x112   :  { %s211_s15 = scalar_lea.hbm %s303_s3, 32 }
 0x113   :  { %p212_p7 = scmp.ne.s32.totalorder %s303_s3, %s211_s15  ;;  %p215_p8 = scmp.lt.u32.totalorder %s211_s15, %s303_s3 }
 0x115   :  { %p217_p9 = pnand %p215_p8, %p212_p7 }
 0x117   :  { %220 = shalt.err (!%p217_p9)
}
 0x118   :  { %122 = dma.vmem_to_hbm [thread:$0]  %s120_s12, 32, %s303_s3, [#allocation4]  }
 0x119   :  { %225 = dma.done.wait [#allocation4], 32  }
 0x11a   :  { %226 = vsyncadd [#allocation4], 4294967264 }
 0x11b   :  { %126 = vsyncpa [#allocation3], 1 }
 0x11c   :  { %127 = vsyncpa [#allocation6], 1 }
 0x11d   :  { %128 = vsyncpa [#allocation4], 1 }

</bundles_post_ra>
